<compile_context>
chip_gen: v7x
topology: tpu7x:2x2x1
jax: 0.10.0
libtpu: 0.0.40
codegen_flags: <defaults>
</compile_context>

<pallas_src>
import math

import jax
import jax.numpy as jnp
from jax.experimental import pallas as pl

# ---- model dimensions (small, consistent with the module) -------------------
B = 2            # batch
N = 8            # sequence length
H = 32           # hidden_size
NH = 4           # num_attention_heads
D = H // NH      # attention_head_size = 8
BN = B * N       # flattened tokens
LN_EPS = 1e-5    # nn.LayerNorm default


def deberta_attention_kernel(hs_ref, mask_ref, w_ref, vec_ref, out_ref):
    """Whole DebertaV2Attention forward (both batch elements) in one shot.

    hs_ref:   (BN, H)    flattened hidden states (prenorm = Identity)
    mask_ref: (BN, BN)   block-diagonal attention mask, 1.0 = may attend
    w_ref:    (H, 4H)    packed [Wq | Wk | Wv | Wo], (in, out) layout
    vec_ref:  (2, 4H)    row0 = [bq | bk | bv | bo], row1 = [gamma | beta | 0...]
    out_ref:  (BN, H)
    """
    hs = hs_ref[...]                                   # (BN, H)  f32
    w = w_ref[...]                                     # (H, 4H)
    vec = vec_ref[...]                                 # (2, 4H)
    maskf = mask_ref[...]                              # (BN, BN)

    wqkv = w[:, 0:3 * H]                               # (H, 3H)
    wo = w[:, 3 * H:4 * H]                             # (H, H)
    bqkv = vec[0:1, 0:3 * H]                           # (1, 3H)
    bo = vec[0:1, 3 * H:4 * H]                         # (1, H)
    gamma = vec[1:2, 0:H]                              # (1, H)
    beta = vec[1:2, H:2 * H]                           # (1, H)

    # --- fused Q/K/V projection: one MXU push, one bias add ------------------
    qkv = jnp.dot(hs, wqkv, preferred_element_type=jnp.float32) + bqkv   # (BN, 3H)

    # --- head-major stacks (leading batch dim) for batched attention dots ----
    inv_scale = 1.0 / (math.sqrt(D) * 1.0)    # scale_factor = 1 (no c2p/p2c)
    q3 = jnp.stack([qkv[:, h * D:(h + 1) * D] for h in range(NH)], 0) * inv_scale
    k3 = jnp.stack([qkv[:, H + h * D:H + (h + 1) * D] for h in range(NH)], 0)
    v3 = jnp.stack([qkv[:, 2 * H + h * D:2 * H + (h + 1) * D] for h in range(NH)], 0)
    # q3/k3/v3: (NH, BN, D)

    # --- scores for ALL heads with ONE batched dot_general --------------------
    s = jnp.einsum('hnd,hmd->hnm', q3, k3,
                   preferred_element_type=jnp.float32)          # (NH, BN, BN)

    # --- XSoftmax semantics: masked_fill(min) -> softmax -> masked probs = 0 --
    mask3 = jnp.broadcast_to(maskf[None, :, :], s.shape)        # (NH, BN, BN)
    neg_min = jnp.finfo(jnp.float32).min
    s = jnp.where(mask3 > 0.0, s, neg_min)
    m = jnp.max(s, axis=-1, keepdims=True)
    e = jnp.exp(s - m) * mask3                                  # masked entries exactly 0
    denom = jnp.sum(e, axis=-1, keepdims=True)
    # exact divide (no approx reciprocal); clamp keeps fully-masked rows at 0
    p = e / jnp.maximum(denom, jnp.float32(1e-30))

    # --- context for ALL heads with ONE batched dot_general -------------------
    ctx = jnp.einsum('hnm,hmd->hnd', p, v3,
                     preferred_element_type=jnp.float32)        # (NH, BN, D)
    # back to (BN, H): single lane-axis concat, no scratch / partial stores
    ctx2d = jnp.concatenate([ctx[h] for h in range(NH)], axis=1)   # (BN, H)

    # --- DebertaV2SelfOutput: dense -> (dropout: identity) -> LN(x + input) ---
    dense_out = jnp.dot(ctx2d, wo, preferred_element_type=jnp.float32) + bo
    x = dense_out + hs                      # residual with query_states (= hs)
    mean = jnp.mean(x, axis=-1, keepdims=True)
    xc = x - mean
    var = jnp.mean(xc * xc, axis=-1, keepdims=True)
    y = xc * jax.lax.rsqrt(var + LN_EPS)
    out_ref[...] = y * gamma + beta


def fuse_params(params):
    wq, bq, wk, bk, wv, bv, wo, bo, gamma, beta = params
    w_all = jnp.concatenate([wq, wk, wv, wo], axis=1)              # (H, 4H) = (32, 128)
    row0 = jnp.concatenate([bq, bk, bv, bo], axis=1)               # (1, 4H)
    row1 = jnp.concatenate([gamma, beta,
                            jnp.zeros((1, 2 * H), jnp.float32)], axis=1)
    vec = jnp.concatenate([row0, row1], axis=0)                    # (2, 4H)
    return w_all, vec


def deberta_attention(hidden_states, attention_mask, params):
    """hidden_states: (B, N, H) f32; attention_mask: (B, N, N) f32 (1 = attendable)."""
    w_all, vec = fuse_params(params)
    hs2d = hidden_states.reshape(BN, H)
    # flattened block-diagonal mask: tokens attend only within their own batch element
    eye = jnp.eye(B, dtype=jnp.float32)
    mask_bn = (eye[:, None, :, None] * attention_mask[:, :, None, :]).reshape(BN, BN)

    # Single collapsed invocation: 4 lane-dense inputs, all operands VMEM-resident.
    out = pl.pallas_call(
        deberta_attention_kernel,
        out_shape=jax.ShapeDtypeStruct((BN, H), jnp.float32),
    )(hs2d, mask_bn, w_all, vec)
    return out.reshape(B, N, H)


def reference_forward(hidden_states, attention_mask, params):
    """Pure-JAX reference matching the PyTorch module semantics."""
    wq, bq, wk, bk, wv, bv, wo, bo, gamma, beta = params
    q = hidden_states @ wq + bq
    k = hidden_states @ wk + bk
    v = hidden_states @ wv + bv

    def split(x):  # (B,N,H) -> (B,NH,N,D)
        return x.reshape(B, N, NH, D).transpose(0, 2, 1, 3)

    qh, kh, vh = split(q), split(k), split(v)
    scores = jnp.einsum('bhqd,bhkd->bhqk', qh, kh) / math.sqrt(D)
    mask = attention_mask[:, None, :, :] > 0
    neg_min = jnp.finfo(jnp.float32).min
    scores = jnp.where(mask, scores, neg_min)
    probs = jax.nn.softmax(scores, axis=-1)
    probs = jnp.where(mask, probs, 0.0)
    ctx = jnp.einsum('bhqk,bhkd->bhqd', probs, vh)
    ctx = ctx.transpose(0, 2, 1, 3).reshape(B, N, H)
    dense_out = ctx @ wo + bo
    x = dense_out + hidden_states
    mean = jnp.mean(x, axis=-1, keepdims=True)
    var = jnp.mean((x - mean) ** 2, axis=-1, keepdims=True)
    return (x - mean) / jnp.sqrt(var + LN_EPS) * gamma + beta


def make_params(key):
    ks = jax.random.split(key, 8)
    scale = 0.02
    wq = scale * jax.random.normal(ks[0], (H, H), jnp.float32)   # (in, out) layout
    wk = scale * jax.random.normal(ks[1], (H, H), jnp.float32)
    wv = scale * jax.random.normal(ks[2], (H, H), jnp.float32)
    wo = scale * jax.random.normal(ks[3], (H, H), jnp.float32)
    bq = scale * jax.random.normal(ks[4], (1, H), jnp.float32)
    bk = scale * jax.random.normal(ks[5], (1, H), jnp.float32)
    bv = scale * jax.random.normal(ks[6], (1, H), jnp.float32)
    bo = scale * jax.random.normal(ks[7], (1, H), jnp.float32)
    gamma = jnp.ones((1, H), jnp.float32)
    beta = jnp.zeros((1, H), jnp.float32)
    return (wq, bq, wk, bk, wv, bv, wo, bo, gamma, beta)


if __name__ == "__main__":
    key = jax.random.PRNGKey(0)
    k_hs, k_p = jax.random.split(key)

    hidden_states = jax.random.normal(k_hs, (B, N, H), jnp.float32)

    # validity: batch 0 fully valid, batch 1 has last 2 tokens padded
    valid = jnp.array([[1.0] * N,
                       [1.0] * (N - 2) + [0.0] * 2], dtype=jnp.float32)   # (B, N)
    attention_mask = valid[:, :, None] * valid[:, None, :]                # (B, N, N)

    params = make_params(k_p)

    out = deberta_attention(hidden_states, attention_mask, params)
    out = jax.block_until_ready(out)

    ref = reference_forward(hidden_states, attention_mask, params)
    assert out.shape == (B, N, H)
    # Softmax reciprocal is exact now; remaining discrepancy comes only from the
    # default TPU f32 matmul precision (shared by kernel and reference), so the
    # tolerance is tightened from 2e-3 to 1e-3.
    assert jnp.allclose(out, ref, atol=1e-3, rtol=1e-3), "kernel mismatch vs reference"

    print("KERNEL_OK")
</pallas_src>

<mosaic_0001>
module attributes {stable_mosaic.version = 11 : i64} {
  func.func @deberta_attention_kernel(%arg0: memref<16x32xf32, #tpu.memory_space<vmem>>, %arg1: memref<16x16xf32, #tpu.memory_space<vmem>>, %arg2: memref<32x128xf32, #tpu.memory_space<vmem>>, %arg3: memref<2x128xf32, #tpu.memory_space<vmem>>, %arg4: memref<16x32xf32, #tpu.memory_space<vmem>>) attributes {dimension_semantics = [], scalar_prefetch = 0 : i64, scratch_operands = 0 : i64, tpu.core_type = #tpu.core_type<tc>} {
    %c0 = arith.constant 0 : index
    %c0_0 = arith.constant 0 : index
    %0 = vector.load %arg0[%c0, %c0_0] : memref<16x32xf32, #tpu.memory_space<vmem>>, vector<16x32xf32>
    %c0_1 = arith.constant 0 : index
    %c0_2 = arith.constant 0 : index
    %1 = vector.load %arg2[%c0_1, %c0_2] : memref<32x128xf32, #tpu.memory_space<vmem>>, vector<32x128xf32>
    %c0_3 = arith.constant 0 : index
    %c0_4 = arith.constant 0 : index
    %2 = vector.load %arg3[%c0_3, %c0_4] : memref<2x128xf32, #tpu.memory_space<vmem>>, vector<2x128xf32>
    %c0_5 = arith.constant 0 : index
    %c0_6 = arith.constant 0 : index
    %3 = vector.load %arg1[%c0_5, %c0_6] : memref<16x16xf32, #tpu.memory_space<vmem>>, vector<16x16xf32>
    %4 = vector.extract_strided_slice %1 {offsets = [0, 0], sizes = [32, 96], strides = [1, 1]} : vector<32x128xf32> to vector<32x96xf32>
    %5 = vector.extract_strided_slice %1 {offsets = [0, 96], sizes = [32, 32], strides = [1, 1]} : vector<32x128xf32> to vector<32x32xf32>
    %6 = vector.extract_strided_slice %2 {offsets = [0, 0], sizes = [1, 96], strides = [1, 1]} : vector<2x128xf32> to vector<1x96xf32>
    %7 = vector.extract_strided_slice %2 {offsets = [0, 96], sizes = [1, 32], strides = [1, 1]} : vector<2x128xf32> to vector<1x32xf32>
    %8 = vector.extract_strided_slice %2 {offsets = [1, 0], sizes = [1, 32], strides = [1, 1]} : vector<2x128xf32> to vector<1x32xf32>
    %9 = vector.extract_strided_slice %2 {offsets = [1, 32], sizes = [1, 32], strides = [1, 1]} : vector<2x128xf32> to vector<1x32xf32>
    %cst = arith.constant dense<0.000000e+00> : vector<16x96xf32>
    %10 = tpu.matmul %0, %4, %cst {dimension_numbers = #tpu.dot_dimension_numbers<[1], [0], [0], [1], [0, 0, 1, 1], [], []>} : vector<16x32xf32>, vector<32x96xf32>, vector<16x96xf32> -> vector<16x96xf32>
    %11 = vector.broadcast %6 : vector<1x96xf32> to vector<16x96xf32>
    %12 = arith.addf %10, %11 : vector<16x96xf32>
    %13 = vector.extract_strided_slice %12 {offsets = [0, 0], sizes = [16, 8], strides = [1, 1]} : vector<16x96xf32> to vector<16x8xf32>
    %14 = vector.extract_strided_slice %12 {offsets = [0, 8], sizes = [16, 8], strides = [1, 1]} : vector<16x96xf32> to vector<16x8xf32>
    %15 = vector.extract_strided_slice %12 {offsets = [0, 16], sizes = [16, 8], strides = [1, 1]} : vector<16x96xf32> to vector<16x8xf32>
    %16 = vector.extract_strided_slice %12 {offsets = [0, 24], sizes = [16, 8], strides = [1, 1]} : vector<16x96xf32> to vector<16x8xf32>
    %17 = vector.shape_cast %13 : vector<16x8xf32> to vector<1x16x8xf32>
    %18 = vector.shape_cast %14 : vector<16x8xf32> to vector<1x16x8xf32>
    %19 = vector.shape_cast %15 : vector<16x8xf32> to vector<1x16x8xf32>
    %20 = vector.shape_cast %16 : vector<16x8xf32> to vector<1x16x8xf32>
    %21 = tpu.concatenate %17, %18, %19, %20 in 0 : vector<1x16x8xf32>, vector<1x16x8xf32>, vector<1x16x8xf32>, vector<1x16x8xf32> -> vector<4x16x8xf32>
    %cst_7 = arith.constant 0.353553385 : f32
    %22 = vector.broadcast %cst_7 : f32 to vector<4x16x8xf32>
    %23 = arith.mulf %21, %22 : vector<4x16x8xf32>
    %24 = vector.extract_strided_slice %12 {offsets = [0, 32], sizes = [16, 8], strides = [1, 1]} : vector<16x96xf32> to vector<16x8xf32>
    %25 = vector.extract_strided_slice %12 {offsets = [0, 40], sizes = [16, 8], strides = [1, 1]} : vector<16x96xf32> to vector<16x8xf32>
    %26 = vector.extract_strided_slice %12 {offsets = [0, 48], sizes = [16, 8], strides = [1, 1]} : vector<16x96xf32> to vector<16x8xf32>
    %27 = vector.extract_strided_slice %12 {offsets = [0, 56], sizes = [16, 8], strides = [1, 1]} : vector<16x96xf32> to vector<16x8xf32>
    %28 = vector.shape_cast %24 : vector<16x8xf32> to vector<1x16x8xf32>
    %29 = vector.shape_cast %25 : vector<16x8xf32> to vector<1x16x8xf32>
    %30 = vector.shape_cast %26 : vector<16x8xf32> to vector<1x16x8xf32>
    %31 = vector.shape_cast %27 : vector<16x8xf32> to vector<1x16x8xf32>
    %32 = tpu.concatenate %28, %29, %30, %31 in 0 : vector<1x16x8xf32>, vector<1x16x8xf32>, vector<1x16x8xf32>, vector<1x16x8xf32> -> vector<4x16x8xf32>
    %33 = vector.extract_strided_slice %12 {offsets = [0, 64], sizes = [16, 8], strides = [1, 1]} : vector<16x96xf32> to vector<16x8xf32>
    %34 = vector.extract_strided_slice %12 {offsets = [0, 72], sizes = [16, 8], strides = [1, 1]} : vector<16x96xf32> to vector<16x8xf32>
    %35 = vector.extract_strided_slice %12 {offsets = [0, 80], sizes = [16, 8], strides = [1, 1]} : vector<16x96xf32> to vector<16x8xf32>
    %36 = vector.extract_strided_slice %12 {offsets = [0, 88], sizes = [16, 8], strides = [1, 1]} : vector<16x96xf32> to vector<16x8xf32>
    %37 = vector.shape_cast %33 : vector<16x8xf32> to vector<1x16x8xf32>
    %38 = vector.shape_cast %34 : vector<16x8xf32> to vector<1x16x8xf32>
    %39 = vector.shape_cast %35 : vector<16x8xf32> to vector<1x16x8xf32>
    %40 = vector.shape_cast %36 : vector<16x8xf32> to vector<1x16x8xf32>
    %41 = tpu.concatenate %37, %38, %39, %40 in 0 : vector<1x16x8xf32>, vector<1x16x8xf32>, vector<1x16x8xf32>, vector<1x16x8xf32> -> vector<4x16x8xf32>
    "tpu.trace_start"() <{level = 10 : i32, message = "hnd,hmd->hnm"}> : () -> ()
    %cst_8 = arith.constant dense<0.000000e+00> : vector<4x16x16xf32>
    %42 = tpu.matmul %23, %32, %cst_8 {dimension_numbers = #tpu.dot_dimension_numbers<[2], [2], [1], [1], [0, 0, 0, 1, 1, 1], [0], [0]>} : vector<4x16x8xf32>, vector<4x16x8xf32>, vector<4x16x16xf32> -> vector<4x16x16xf32>
    "tpu.trace_stop"() : () -> ()
    %43 = vector.shape_cast %3 : vector<16x16xf32> to vector<1x16x16xf32>
    %44 = vector.shape_cast %43 : vector<1x16x16xf32> to vector<1x16x16xf32>
    %45 = vector.broadcast %44 : vector<1x16x16xf32> to vector<4x16x16xf32>
    %cst_9 = arith.constant 0.000000e+00 : f32
    %46 = vector.broadcast %cst_9 : f32 to vector<4x16x16xf32>
    %47 = arith.cmpf ogt, %45, %46 : vector<4x16x16xf32>
    %cst_10 = arith.constant -3.40282347E+38 : f32
    %48 = vector.broadcast %cst_10 : f32 to vector<4x16x16xf32>
    %49 = arith.select %47, %42, %48 : vector<4x16x16xi1>, vector<4x16x16xf32>
    %cst_11 = arith.constant dense<0xFF800000> : vector<4x16xf32>
    %50 = vector.multi_reduction <maximumf>, %49, %cst_11 [2] : vector<4x16x16xf32> to vector<4x16xf32>
    %51 = vector.shape_cast %50 : vector<4x16xf32> to vector<4x16x1xf32>
    %52 = vector.broadcast %51 : vector<4x16x1xf32> to vector<4x16x16xf32>
    %53 = arith.subf %49, %52 : vector<4x16x16xf32>
    %54 = math.exp %53 : vector<4x16x16xf32>
    %55 = arith.mulf %54, %45 : vector<4x16x16xf32>
    %cst_12 = arith.constant dense<0.000000e+00> : vector<4x16xf32>
    %56 = vector.multi_reduction <add>, %55, %cst_12 [2] : vector<4x16x16xf32> to vector<4x16xf32>
    %57 = vector.shape_cast %56 : vector<4x16xf32> to vector<4x16x1xf32>
    %cst_13 = arith.constant 1.000000e-30 : f32
    %58 = vector.broadcast %cst_13 : f32 to vector<4x16x1xf32>
    %59 = arith.maximumf %57, %58 : vector<4x16x1xf32>
    %60 = vector.broadcast %59 : vector<4x16x1xf32> to vector<4x16x16xf32>
    %61 = arith.divf %55, %60 : vector<4x16x16xf32>
    "tpu.trace_start"() <{level = 10 : i32, message = "hnm,hmd->hnd"}> : () -> ()
    %cst_14 = arith.constant dense<0.000000e+00> : vector<4x16x8xf32>
    %62 = tpu.matmul %61, %41, %cst_14 {dimension_numbers = #tpu.dot_dimension_numbers<[2], [1], [1], [2], [0, 0, 0, 1, 1, 2], [0], [0]>} : vector<4x16x16xf32>, vector<4x16x8xf32>, vector<4x16x8xf32> -> vector<4x16x8xf32>
    "tpu.trace_stop"() : () -> ()
    %63 = vector.extract_strided_slice %62 {offsets = [0, 0, 0], sizes = [1, 16, 8], strides = [1, 1, 1]} : vector<4x16x8xf32> to vector<1x16x8xf32>
    %64 = vector.shape_cast %63 : vector<1x16x8xf32> to vector<16x8xf32>
    %65 = vector.extract_strided_slice %62 {offsets = [1, 0, 0], sizes = [1, 16, 8], strides = [1, 1, 1]} : vector<4x16x8xf32> to vector<1x16x8xf32>
    %66 = vector.shape_cast %65 : vector<1x16x8xf32> to vector<16x8xf32>
    %67 = vector.extract_strided_slice %62 {offsets = [2, 0, 0], sizes = [1, 16, 8], strides = [1, 1, 1]} : vector<4x16x8xf32> to vector<1x16x8xf32>
    %68 = vector.shape_cast %67 : vector<1x16x8xf32> to vector<16x8xf32>
    %69 = vector.extract_strided_slice %62 {offsets = [3, 0, 0], sizes = [1, 16, 8], strides = [1, 1, 1]} : vector<4x16x8xf32> to vector<1x16x8xf32>
    %70 = vector.shape_cast %69 : vector<1x16x8xf32> to vector<16x8xf32>
    %71 = tpu.concatenate %64, %66, %68, %70 in 1 : vector<16x8xf32>, vector<16x8xf32>, vector<16x8xf32>, vector<16x8xf32> -> vector<16x32xf32>
    %cst_15 = arith.constant dense<0.000000e+00> : vector<16x32xf32>
    %72 = tpu.matmul %71, %5, %cst_15 {dimension_numbers = #tpu.dot_dimension_numbers<[1], [0], [0], [1], [0, 0, 1, 1], [], []>} : vector<16x32xf32>, vector<32x32xf32>, vector<16x32xf32> -> vector<16x32xf32>
    %73 = vector.broadcast %7 : vector<1x32xf32> to vector<16x32xf32>
    %74 = arith.addf %72, %73 : vector<16x32xf32>
    %75 = arith.addf %74, %0 : vector<16x32xf32>
    %cst_16 = arith.constant dense<0.000000e+00> : vector<16xf32>
    %76 = vector.multi_reduction <add>, %75, %cst_16 [1] : vector<16x32xf32> to vector<16xf32>
    %77 = vector.shape_cast %76 : vector<16xf32> to vector<16x1xf32>
    %cst_17 = arith.constant 3.200000e+01 : f32
    %78 = vector.broadcast %cst_17 : f32 to vector<16x1xf32>
    %79 = arith.divf %77, %78 : vector<16x1xf32>
    %80 = vector.broadcast %79 : vector<16x1xf32> to vector<16x32xf32>
    %81 = arith.subf %75, %80 : vector<16x32xf32>
    %82 = arith.mulf %81, %81 : vector<16x32xf32>
    %cst_18 = arith.constant dense<0.000000e+00> : vector<16xf32>
    %83 = vector.multi_reduction <add>, %82, %cst_18 [1] : vector<16x32xf32> to vector<16xf32>
    %84 = vector.shape_cast %83 : vector<16xf32> to vector<16x1xf32>
    %cst_19 = arith.constant 3.200000e+01 : f32
    %85 = vector.broadcast %cst_19 : f32 to vector<16x1xf32>
    %86 = arith.divf %84, %85 : vector<16x1xf32>
    %cst_20 = arith.constant 9.99999974E-6 : f32
    %87 = vector.broadcast %cst_20 : f32 to vector<16x1xf32>
    %88 = arith.addf %86, %87 : vector<16x1xf32>
    %89 = math.rsqrt %88 : vector<16x1xf32>
    %90 = vector.broadcast %89 : vector<16x1xf32> to vector<16x32xf32>
    %91 = arith.mulf %81, %90 : vector<16x32xf32>
    %92 = vector.broadcast %8 : vector<1x32xf32> to vector<16x32xf32>
    %93 = arith.mulf %91, %92 : vector<16x32xf32>
    %94 = vector.broadcast %9 : vector<1x32xf32> to vector<16x32xf32>
    %95 = arith.addf %93, %94 : vector<16x32xf32>
    %c0_21 = arith.constant 0 : index
    %c0_22 = arith.constant 0 : index
    %96 = vector.load %arg4[%c0_21, %c0_22] : memref<16x32xf32, #tpu.memory_space<vmem>>, vector<16x32xf32>
    tpu.vector_store %arg4[%c0_21, %c0_22], %95 {strides = array<i32>} : memref<16x32xf32, #tpu.memory_space<vmem>>, vector<16x32xf32>,
    return
  }
}

</mosaic_0001>

<bundles_post_ra>
// kernel: tpu_custom_call.1
= control target key start
LH: loop header
LB: loop body
LE: loop exit
PB: predicated region body
PF: predicated region fallthrough
CT: control target
= control target key end

     0   :  { %9 = vsyncpa [#allocation3], 0  ;;  %s1904_s0 = inlined_call_operand.hbm [shape: f32[16,32], index: 0, kind: input, shape index: {}]   ;;  %s1905_s1 = inlined_call_operand.hbm [shape: f32[16,16], index: 1, kind: input, shape index: {}]   ;;  %s1906_s2 = inlined_call_operand.hbm [shape: f32[32,128], index: 2, kind: input, shape index: {}]   ;;  %s1907_s3 = inlined_call_operand.vmem [shape: f32[2,128], index: 3, kind: input, shape index: {}]   ;;  %s1908_s4 = inlined_call_operand.hbm [shape: f32[16,32], index: 4, kind: output, shape index: {}]  }
   0x1   :  { %10 = vsyncpa [#allocation6], 0 }
   0x2   :  { %11 = vsyncpa [#allocation4], 0  ;;  %s1595_s15 = smov [#allocation5]   ;;  %s1596_s17 = smov [#allocation2]  }
   0x3   :  { %s29_s16 = sshll.u32 %s1595_s15, 4  ;;  %s17_s18 = sshll.u32 %s1596_s17, 4  ;;  %s30_s16 = int_to_ptr.vmem [resolvable:$true] %s29_s16  ;;  %s1634_s18 = int_to_ptr.vmem [resolvable:$true] %s17_s18 }
   0x4   :  { %s1501_s21 = scalar_lea.hbm %s1905_s1, 256 }
   0x5   :  { %p1502_p0 = scmp.ne.s32.totalorder %s1905_s1, %s1501_s21  ;;  %p1505_p1 = scmp.lt.u32.totalorder %s1501_s21, %s1905_s1 }
   0x7   :  { %p1507_p2 = pnand %p1505_p1, %p1502_p0 }
   0x9   :  { %1510 = shalt.err (!%p1507_p2)
}
   0xa   :  { %s1511_s26 = scalar_lea.vmem %s30_s16, 256  ;;  %p1516_p4 = scmp.lt.s32.totalorder %s30_s16, %s30_s16 }
   0xb   :  { %p1512_p3 = scmp.ne.s32.totalorder %s30_s16, %s1511_s26  ;;  %p1517_p5 = scmp.lt.s32.totalorder %s1511_s26, %s1511_s26 }
   0xd   :  { %p1518_p6 = por %p1517_p5, %p1516_p4 }
   0xf   :  { %p1519_p7 = pnand %p1518_p6, %p1512_p3 }
  0x11   :  { %1522 = shalt.err (!%p1519_p7)
}
  0x12   :  { %s1597_s27 = smov 128   ;;  %s1598_s28 = smov 8  }
  0x13   :  { %35 = dma.hbm_to_vmem [thread:$0]  %s1905_s1, 256, %s30_s16, [#allocation6], %s1597_s27, %s1597_s27, %s1598_s28  }
  0x14   :  { %s1523_s7 = scalar_lea.hbm %s1904_s0, 256 }
  0x15   :  { %p1524_p8 = scmp.ne.s32.totalorder %s1904_s0, %s1523_s7  ;;  %p1527_p9 = scmp.lt.u32.totalorder %s1523_s7, %s1904_s0 }
  0x17   :  { %p1529_p10 = pnand %p1527_p9, %p1524_p8 }
  0x19   :  { %1532 = shalt.err (!%p1529_p10)
}
  0x1a   :  { %s1533_s12 = scalar_lea.vmem %s1634_s18, 256  ;;  %p1538_p12 = scmp.lt.s32.totalorder %s1634_s18, %s1634_s18 }
  0x1b   :  { %p1534_p11 = scmp.ne.s32.totalorder %s1634_s18, %s1533_s12  ;;  %p1539_p13 = scmp.lt.s32.totalorder %s1533_s12, %s1533_s12 }
  0x1d   :  { %p1540_p0 = por %p1539_p13, %p1538_p12 }
  0x1f   :  { %p1541_p1 = pnand %p1540_p0, %p1534_p11 }
  0x21   :  { %1544 = shalt.err (!%p1541_p1)
}
  0x22   :  { %23 = dma.hbm_to_vmem [thread:$0]  %s1904_s0, 256, %s1634_s18, [#allocation3], %s1597_s27, %s1597_s27, %s1598_s28  }
  0x23   :  { %s1599_s14 = smov [#allocation7]   ;;  %s1545_s19 = scalar_lea.hbm %s1906_s2, 512 }
  0x24   :  { %s41_s15 = sshll.u32 %s1599_s14, 4  ;;  %p1546_p2 = scmp.ne.s32.totalorder %s1906_s2, %s1545_s19  ;;  %s42_s15 = int_to_ptr.vmem [resolvable:$true] %s41_s15 }
  0x25   :  { %p1549_p3 = scmp.lt.u32.totalorder %s1545_s19, %s1906_s2 }
  0x27   :  { %p1551_p4 = pnand %p1549_p3, %p1546_p2 }
  0x29   :  { %1554 = shalt.err (!%p1551_p4)
}
  0x2a   :  { %s1555_s24 = scalar_lea.vmem %s42_s15, 512  ;;  %p1560_p6 = scmp.lt.s32.totalorder %s42_s15, %s42_s15 }
  0x2b   :  { %p1556_p5 = scmp.ne.s32.totalorder %s42_s15, %s1555_s24  ;;  %p1561_p7 = scmp.lt.s32.totalorder %s1555_s24, %s1555_s24 }
  0x2d   :  { %p1562_p8 = por %p1561_p7, %p1560_p6 }
  0x2f   :  { %p1563_p9 = pnand %p1562_p8, %p1556_p5 }
  0x31   :  { %1566 = shalt.err (!%p1563_p9)
}
  0x32   :  { %47 = dma.hbm_to_vmem [thread:$0]  %s1906_s2, 512, %s42_s15, [#allocation6], %s1597_s27, %s1597_s27, %s1598_s28  }
  0x33   :  { %1589 = dma.done.wait [#allocation3], 256  }
  0x34   :  { %1590 = vsyncadd [#allocation3], 4294967040 }
  0x35   :  { %1591 = dma.done.wait [#allocation6], 768  }
  0x36   :  { %1592 = vsyncadd [#allocation6], 4294966528  ;;  %vm72_vm0 = vcmask 261120   ;;  %v1686_v0 = vld [vmem:[#allocation7] sm:$0xff]  ;;  %v1688_v1 = vld [vmem:[#allocation7 + $0x8] sm:$0xff]  ;;  %v68_v9 = vlaneseq  ;;  %s1600_s26 = smov 112  }
  0x37   :  { %v1690_v2 = vld [vmem:[#allocation7 + $0x10] sm:$0xff]  ;;  %v1455_v3 = vpack.i.bf16 %v1688_v1, %v1686_v0  ;;  %v1345_v4 = vpack.c.bf16 %v1688_v1, %v1686_v0  ;;  %v1696_v5 = vld [vmem:[#allocation7 + $0x18] sm:$0xff]  ;;  %v1698_v6 = vld [vmem:[#allocation2] sm:$0xff]  ;;  %vm186_vm1 = vcmask 64512   ;;  %s1601_s29 = smov 120   ;;  %s1603_s30 = smov 96  }
  0x38   :  { %v1349_v7 = vpack.c.bf16 %v1696_v5, %v1690_v2  ;;  %1275 = vmatprep.mubr.msk.f32.mxu0 %vm72_vm0, %v1698_v6  ;;  %v1704_v8 = vld [vmem:[#allocation2 + $0x8] sm:$0xff]  ;;  %v1708_v10 = vshrl.u32 %v68_v9, 7  ;;  %v1714_v12 = vld [vmem:[%s1907_s3] sm:$0x3]  ;;  %s1602_s3 = smov 104   ;;  %vm1741_vm2 = vmpackc.low %vm186_vm1, %vm186_vm1  ;;  %vm549_vm5 = vcmask 130048  }
  0x39   :  { %1346 = vmatprep.subr.bf16.mxu0 %v1345_v4  ;;  %v1767_v53 = vld [vmem:[#allocation5 + $0x8] sm:$0xff]  ;;  %v1769_v54 = vld [vmem:[#allocation5] sm:$0xff]  ;;  %s1604_s5 = smov 64   ;;  %s1605_s6 = smov 32   ;;  %vm1030_vm6 = vcmask 195584  }
  0x3a   :  { %1348 = vmatpush3.bf16.msra.mxu0 %v1345_v4  ;;  %v70_v11 = vsub.s32 0, %v1708_v10  ;;  %vm540_vm3 = vcmp.gt.f32.partialorder %v1767_v53, 0.0  ;;  %vm539_vm4 = vcmp.gt.f32.partialorder %v1769_v54, 0.0  ;;  %s1606_s7 = smov 16   ;;  %s1607_s8 = smov 24  }
  0x3b   :  { %1350 = vmatprep.subr.bf16.mxu0 %v1349_v7  ;;  %s1608_s9 = smov [#allocation8]  }
  0x3c   :  { %v1717_v13 = vrot.slane %v1714_v12, %v70_v11  ;;  %s1182_s10 = sshll.u32 %s1608_s9, 4  ;;  %s1183_s10 = int_to_ptr.vmem [resolvable:$true] %s1182_s10 }
  0x3d   :  { %s1567_s11 = scalar_lea.vmem %s1183_s10, 256  ;;  %p1572_p11 = scmp.lt.s32.totalorder %s1183_s10, %s1183_s10 }
  0x3e   :  { %1352 = vmatpush3.bf16.msra.mxu0 %v1349_v7  ;;  %p1568_p10 = scmp.ne.s32.totalorder %s1183_s10, %s1567_s11  ;;  %p1573_p12 = scmp.lt.s32.totalorder %s1567_s11, %s1567_s11 }
  0x40   :  { %p1574_p13 = por %p1573_p12, %p1572_p11 }
  0x41   :  { %1276 = vmatmul.mubr.msk.f32.vlgmr.msra.gmra.mrb[0].mxu0 %vm72_vm0, %v1704_v8 }
  0x42   :  { %p1575_p0 = pnand %p1574_p13, %p1568_p10 }
 0x114   :  { %v1277_v14 = vpop.f32.mrb[0].mxu0 }
 0x115   :  { %v151_v15 = vadd.f32 %v1277_v14, %v1717_v13  ;;  %v145_v16 = vpop.f32.mrb[1].mxu0 }
 0x116   :  { %v146_v17 = vadd.f32 %v145_v16, %v1717_v13 }
 0x117   :  { %164 = vrot.lane.b32.xlu1 %v151_v15, %s1600_s26  ;;  %v175_v35 = vmul.f32 0.35355338, %v151_v15 }
 0x118   :  { %156 = vrot.lane.b32.xlu0 %v146_v17, %s1601_s29  ;;  %v174_v18 = vmul.f32 0.35355338, %v146_v17  ;;  %v1721_v19 = vpack.i.bf16 %v151_v15, %v146_v17 }
 0x11a   :  { %1282 = vmatprep.mubr.msk.f32.mxu1 %vm186_vm1, %v174_v18 }
 0x11b   :  { %162 = vrot.lane.b32.xlu1 %v146_v17, %s1600_s26 }
 0x11c   :  { %158 = vrot.lane.b32.xlu0 %v151_v15, %s1601_s29 }
 0x11f   :  { %170 = vrot.lane.b32.xlu1 %v151_v15, %s1602_s3 }
 0x120   :  { %168 = vrot.lane.b32.xlu0 %v146_v17, %s1602_s3 }
 0x124   :  { %1416 = vrot.lane.b32.xlu0 %v1721_v19, %s1603_s30 }
 0x189   :  { %v165_v20 = vpop.permute.xlu1 %164 }
 0x18a   :  { %v157_v21 = vpop.permute.xlu0 %156  ;;  %v179_v49 = vmul.f32 0.35355338, %v165_v20 }
 0x18b   :  { %v176_v22 = vmul.f32 0.35355338, %v157_v21 }
 0x18d   :  { %v163_v23 = vpop.permute.xlu1 %162  ;;  %1289 = vmatprep.mubr.msk.f32.mxu0 %vm186_vm1, %v176_v22 }
 0x18e   :  { %v1727_v24 = vpack.i.bf16 %v165_v20, %v163_v23  ;;  %v159_v25 = vpop.permute.xlu0 %158  ;;  %v178_v36 = vmul.f32 0.35355338, %v163_v23 }
 0x18f   :  { %v1729_v26 = vpack.i.bf16 %v159_v25, %v157_v21  ;;  %v177_v50 = vmul.f32 0.35355338, %v159_v25 }
 0x190   :  { %1426 = vrot.lane.b32.xlu0 %v1727_v24, %s1603_s30 }
 0x191   :  { %v171_v27 = vpop.permute.xlu1 %170  ;;  %1421 = vrot.lane.b32.xlu1 %v1729_v26, %s1603_s30 }
 0x192   :  { %v169_v28 = vpop.permute.xlu0 %168  ;;  %v181_v52 = vmul.f32 0.35355338, %v171_v27 }
 0x193   :  { %v1735_v29 = vpack.i.bf16 %v171_v27, %v169_v28  ;;  %v180_v51 = vmul.f32 0.35355338, %v169_v28 }
 0x195   :  { %1431 = vrot.lane.b32.xlu1 %v1735_v29, %s1603_s30 }
 0x196   :  { %v1417_v30 = vpop.permute.xlu0 %1416 }
 0x197   :  { %v1419_v31 = vunpack.i.h.bf16 %v1417_v30  ;;  %v1418_v32 = vunpack.i.l.bf16 %v1417_v30 }
 0x199   :  { %v1353_v34 = vpack.c.bf16 %v1419_v31, %v1418_v32 }
 0x19b   :  { %1355 = vmatprep.subr.msk.bf16.mxu1 %vm1741_vm2, %v1353_v34 }
 0x19c   :  { %1358 = vmatpush3.bf16.xpose.msk.msra.mxu1 %vm1741_vm2, %v1353_v34 }
 0x1a3   :  { %1283 = vmatmul.mubr.msk.f32.vlgmr.msra.gmra.mrb[0].mxu1 %vm186_vm1, %v175_v35 }
 0x1a4   :  { %1296 = vmatprep.mubr.msk.f32.mxu1 %vm186_vm1, %v178_v36 }
 0x202   :  { %v1427_v37 = vpop.permute.xlu0 %1426 }
 0x203   :  { %v1429_v38 = vunpack.i.h.bf16 %v1427_v37  ;;  %v1428_v39 = vunpack.i.l.bf16 %v1427_v37  ;;  %v1422_v40 = vpop.permute.xlu1 %1421 }
 0x204   :  { %v1424_v41 = vunpack.i.h.bf16 %v1422_v40  ;;  %v1423_v42 = vunpack.i.l.bf16 %v1422_v40 }
 0x205   :  { %v1365_v43 = vpack.c.bf16 %v1429_v38, %v1428_v39 }
 0x206   :  { %v1359_v44 = vpack.c.bf16 %v1424_v41, %v1423_v42 }
 0x207   :  { %v1432_v45 = vpop.permute.xlu1 %1431  ;;  %1367 = vmatprep.subr.msk.bf16.mxu1 %vm1741_vm2, %v1365_v43 }
 0x208   :  { %v1434_v46 = vunpack.i.h.bf16 %v1432_v45  ;;  %v1433_v47 = vunpack.i.l.bf16 %v1432_v45  ;;  %1361 = vmatprep.subr.msk.bf16.mxu0 %vm1741_vm2, %v1359_v44  ;;  %1370 = vmatpush3.bf16.xpose.msk.msra.mxu1 %vm1741_vm2, %v1365_v43 }
 0x209   :  { %1364 = vmatpush3.bf16.xpose.msk.msra.mxu0 %vm1741_vm2, %v1359_v44 }
 0x20a   :  { %v1371_v48 = vpack.c.bf16 %v1434_v46, %v1433_v47 }
 0x20c   :  { %1373 = vmatprep.subr.msk.bf16.mxu0 %vm1741_vm2, %v1371_v48 }
 0x20f   :  { %1297 = vmatmul.mubr.msk.f32.vlgmr.msra.gmra.mrb[2].mxu1 %vm186_vm1, %v179_v49 }
 0x210   :  { %1290 = vmatmul.mubr.msk.f32.vlgmr.msra.gmra.mrb[2].mxu0 %vm186_vm1, %v177_v50 }
 0x211   :  { %1376 = vmatpush3.bf16.xpose.msk.msra.mxu0 %vm1741_vm2, %v1371_v48  ;;  %1303 = vmatprep.mubr.msk.f32.mxu0 %vm186_vm1, %v180_v51 }
 0x218   :  { %1304 = vmatmul.mubr.msk.f32.vlgmr.msra.gmra.mrb[4].mxu0 %vm186_vm1, %v181_v52 }
 0x276   :  { %v1284_v55 = vpop.f32.mrb[0].mxu1 }
 0x277   :  { %v542_v56 = vsel %vm540_vm3, %v1284_v55, -3.4028235e+38  ;;  %v263_v57 = vpop.f32.mrb[1].mxu1 }
 0x278   :  { %v541_v58 = vsel %vm539_vm4, %v263_v57, -3.4028235e+38  ;;  %v553_v59 = vsel %vm549_vm5, %v542_v56, -inf }
 0x279   :  { %554 = vmax.xlane.f32.xlu1 %v553_v59  ;;  %v550_v60 = vsel %vm549_vm5, %v541_v58, -inf }
 0x27a   :  { %551 = vmax.xlane.f32.xlu0 %v550_v60 }
 0x2e2   :  { %v1298_v61 = vpop.f32.mrb[2].mxu1 }
 0x2e3   :  { %v1291_v62 = vpop.f32.mrb[2].mxu0  ;;  %v441_v63 = vpop.f32.mrb[3].mxu1  ;;  %v546_v17 = vsel %vm540_vm3, %v1298_v61, -3.4028235e+38 }
 0x2e4   :  { %v545_v4 = vsel %vm539_vm4, %v441_v63, -3.4028235e+38  ;;  %v352_v7 = vpop.f32.mrb[3].mxu0  ;;  %v544_v15 = vsel %vm540_vm3, %v1291_v62, -3.4028235e+38  ;;  %v565_v22 = vsel %vm549_vm5, %v546_v17, -inf }
 0x2e5   :  { %v543_v9 = vsel %vm539_vm4, %v352_v7, -3.4028235e+38  ;;  %v562_v11 = vsel %vm549_vm5, %v545_v4, -inf  ;;  %v559_v16 = vsel %vm549_vm5, %v544_v15, -inf }
 0x2e6   :  { %563 = vmax.xlane.f32.xlu1 %v562_v11  ;;  %v556_v14 = vsel %vm549_vm5, %v543_v9, -inf }
 0x2e7   :  { %557 = vmax.xlane.f32.xlu0 %v556_v14 }
 0x2eb   :  { %v1305_v18 = vpop.f32.mrb[4].mxu0  ;;  %560 = vmax.xlane.f32.xlu0 %v559_v16 }
 0x2ec   :  { %v530_v20 = vpop.f32.mrb[5].mxu0  ;;  %v548_v25 = vsel %vm540_vm3, %v1305_v18, -3.4028235e+38 }
 0x2ed   :  { %v1792_v21 = vsel %vm539_vm4, %v530_v20, -3.4028235e+38  ;;  %v571_v27 = vsel %vm549_vm5, %v548_v25, -inf }
 0x2ee   :  { %v568_v23 = vsel %vm549_vm5, %v1792_v21, -inf }
 0x2ef   :  { %566 = vmax.xlane.f32.xlu0 %v565_v22  ;;  %569 = vmax.xlane.f32.xlu1 %v568_v23 }
 0x2f3   :  { %572 = vmax.xlane.f32.xlu0 %v571_v27 }
 0x300   :  { %1436 = vrot.lane.b32.xlu1 %v1721_v19, %s1604_s5 }
 0x306   :  { %v555_v28 = vpop.xlane.xlu1 %554 }
 0x307   :  { %v575_v30 = vsub.f32 %v542_v56, %v555_v28  ;;  %v552_v31 = vpop.xlane.xlu0 %551 }
 0x308   :  { %v574_v33 = vsub.f32 %v541_v58, %v552_v31 }
 0x309   :  { %v584_v32 = vmul.f32 1.442695, %v575_v30 }
 0x30a   :  { %v582_v34 = vmul.f32 1.442695, %v574_v33 }
 0x30b   :  { %1465 = vpow2.f32 %v584_v32 }
 0x30c   :  { %1467 = vpow2.f32 %v582_v34 }
 0x315   :  { %v1466_v35 = vpop.eup %1465 }
 0x316   :  { %v1803_v36 = vmul.f32 %v1466_v35, %v1767_v53  ;;  %v1468_v38 = vpop.eup %1467 }
 0x317   :  { %v1808_v39 = vmul.f32 %v1468_v38, %v1769_v54 }
 0x318   :  { %v609_v37 = vsel %vm549_vm5, %v1803_v36, 0.0 }
 0x319   :  { %610 = vadd.xlane.f32.xlu0 %v609_v37  ;;  %v606_v19 = vsel %vm549_vm5, %v1808_v39, 0.0 }
 0x324   :  { %607 = vadd.xlane.f32.xlu1 %v606_v19  ;;  %v1460_v19 = vpack.i.bf16 %v1696_v5, %v1690_v2 }
 0x373   :  { %v564_v40 = vpop.xlane.xlu1 %563 }
 0x374   :  { %v578_v41 = vsub.f32 %v545_v4, %v564_v40  ;;  %v558_v42 = vpop.xlane.xlu0 %557 }
 0x375   :  { %v576_v43 = vsub.f32 %v543_v9, %v558_v42 }
 0x376   :  { %v590_v44 = vmul.f32 1.442695, %v578_v41 }
 0x377   :  { %v586_v45 = vmul.f32 1.442695, %v576_v43 }
 0x378   :  { %1469 = vpow2.f32 %v590_v44  ;;  %v561_v46 = vpop.xlane.xlu0 %560 }
 0x379   :  { %1471 = vpow2.f32 %v586_v45  ;;  %v577_v47 = vsub.f32 %v544_v15, %v561_v46 }
 0x37b   :  { %v588_v48 = vmul.f32 1.442695, %v577_v47 }
 0x37c   :  { %v567_v49 = vpop.xlane.xlu0 %566  ;;  %v570_v50 = vpop.xlane.xlu1 %569 }
 0x37d   :  { %1473 = vpow2.f32 %v588_v48  ;;  %v579_v51 = vsub.f32 %v546_v17, %v567_v49  ;;  %v580_v27 = vsub.f32 %v1792_v21, %v570_v50 }
 0x37f   :  { %v592_v52 = vmul.f32 1.442695, %v579_v51  ;;  %v594_v28 = vmul.f32 1.442695, %v580_v27 }
 0x380   :  { %v573_v55 = vpop.xlane.xlu0 %572  ;;  %v1437_v56 = vpop.permute.xlu1 %1436 }
 0x381   :  { %1475 = vpow2.f32 %v592_v52  ;;  %v581_v57 = vsub.f32 %v548_v25, %v573_v55  ;;  %v1439_v58 = vunpack.i.h.bf16 %v1437_v56  ;;  %v1438_v59 = vunpack.i.l.bf16 %v1437_v56 }
 0x382   :  { %v1470_v60 = vpop.eup %1469 }
 0x383   :  { %v1472_v61 = vpop.eup %1471  ;;  %v596_v62 = vmul.f32 1.442695, %v581_v57  ;;  %v1377_v63 = vpack.c.bf16 %v1439_v58, %v1438_v59  ;;  %v1815_v9 = vmul.f32 %v1470_v60, %v1769_v54 }
 0x384   :  { %v600_v4 = vmul.f32 %v1472_v61, %v1769_v54 }
 0x385   :  { %1477 = vpow2.f32 %v596_v62  ;;  %1378 = vmatprep.subr.bf16.mxu1 %v1377_v63  ;;  %v618_v16 = vsel %vm549_vm5, %v1815_v9, 0.0 }
 0x386   :  { %1380 = vmatpush3.bf16.msra.mxu1 %v1377_v63  ;;  %v612_v7 = vsel %vm549_vm5, %v600_v4, 0.0  ;;  %1479 = vpow2.f32 %v594_v28 }
 0x387   :  { %v1474_v11 = vpop.eup %1473  ;;  %613 = vadd.xlane.f32.xlu1 %v612_v7 }
 0x388   :  { %v1818_v14 = vmul.f32 %v1474_v11, %v1767_v53 }
 0x38a   :  { %v615_v15 = vsel %vm549_vm5, %v1818_v14, 0.0 }
 0x38b   :  { %v1476_v17 = vpop.eup %1475  ;;  %616 = vadd.xlane.f32.xlu0 %v615_v15  ;;  %619 = vadd.xlane.f32.xlu1 %v618_v16 }
 0x38c   :  { %v1825_v18 = vmul.f32 %v1476_v17, %v1767_v53 }
 0x38e   :  { %v621_v20 = vsel %vm549_vm5, %v1825_v18, 0.0 }
 0x38f   :  { %v1478_v22 = vpop.eup %1477  ;;  %622 = vadd.xlane.f32.xlu0 %v621_v20 }
 0x390   :  { %v1830_v23 = vmul.f32 %v1478_v22, %v1767_v53  ;;  %v1480_v53 = vpop.eup %1479 }
 0x391   :  { %v1840_v34 = vmul.f32 %v1480_v53, %v1769_v54 }
 0x392   :  { %v627_v25 = vsel %vm549_vm5, %v1830_v23, 0.0 }
 0x393   :  { %628 = vadd.xlane.f32.xlu0 %v627_v25 }
 0x39c   :  { %1446 = vrot.lane.b32.xlu1 %v1727_v24, %s1604_s5  ;;  %v624_v24 = vsel %vm549_vm5, %v1840_v34, 0.0 }
 0x3a6   :  { %v611_v30 = vpop.xlane.xlu0 %610 }
 0x3a7   :  { %v631_v31 = vmax.f32 %v611_v30, 1e-30 }
 0x3a9   :  { %1441 = vrot.lane.b32.xlu0 %v1729_v26, %s1604_s5  ;;  %1481 = vrcp.f32 %v631_v31 }
 0x3ad   :  { %1456 = vrot.lane.b32.xlu0 %v1455_v3, %s1605_s6 }
 0x3b1   :  { %v608_v32 = vpop.xlane.xlu1 %607 }
 0x3b2   :  { %v630_v33 = vmax.f32 %v608_v32, 1e-30 }
 0x3b3   :  { %v1482_v35 = vpop.eup %1481 }
 0x3b4   :  { %1483 = vrcp.f32 %v630_v33  ;;  %v641_v26 = vmul.f32 %v1482_v35, %v1803_v36 }
 0x3be   :  { %v1484_v37 = vpop.eup %1483 }
 0x3bf   :  { %v639_v21 = vmul.f32 %v1484_v37, %v1808_v39 }
 0x3c0   :  { %625 = vadd.xlane.f32.xlu1 %v624_v24 }
 0x3c1   :  { %1310 = vmatprep.mubr.msk.f32.mxu1 %vm549_vm5, %v639_v21 }
 0x3c2   :  { %1311 = vmatmul.mubr.msk.f32.vlgmr.msra.gmra.mrb[4].mxu1 %vm549_vm5, %v641_v26 }
 0x3d1   :  { %1451 = vrot.lane.b32.xlu1 %v1735_v29, %s1604_s5 }
 0x3d5   :  { %1461 = vrot.lane.b32.xlu1 %v1460_v19, %s1605_s6 }
 0x414   :  { %v614_v38 = vpop.xlane.xlu1 %613 }
 0x415   :  { %v632_v54 = vmax.f32 %v614_v38, 1e-30 }
 0x417   :  { %1485 = vrcp.f32 %v632_v54 }
 0x418   :  { %v617_v36 = vpop.xlane.xlu0 %616  ;;  %v620_v39 = vpop.xlane.xlu1 %619 }
 0x419   :  { %v633_v40 = vmax.f32 %v617_v36, 1e-30  ;;  %v634_v41 = vmax.f32 %v620_v39, 1e-30 }
 0x41b   :  { %1487 = vrcp.f32 %v633_v40 }
 0x41c   :  { %v623_v42 = vpop.xlane.xlu0 %622  ;;  %1489 = vrcp.f32 %v634_v41  ;;  %v1447_v2 = vpop.permute.xlu1 %1446 }
 0x41d   :  { %v635_v29 = vmax.f32 %v623_v42, 1e-30  ;;  %v1449_v0 = vunpack.i.h.bf16 %v1447_v2  ;;  %v1448_v1 = vunpack.i.l.bf16 %v1447_v2 }
 0x41f   :  { %1491 = vrcp.f32 %v635_v29  ;;  %v1385_v50 = vpack.c.bf16 %v1449_v0, %v1448_v1 }
 0x420   :  { %v629_v43 = vpop.xlane.xlu0 %628 }
 0x421   :  { %v1486_v44 = vpop.eup %1485  ;;  %v637_v57 = vmax.f32 %v629_v43, 1e-30 }
 0x422   :  { %v643_v5 = vmul.f32 %v1486_v44, %v600_v4 }
 0x423   :  { %1493 = vrcp.f32 %v637_v57 }
 0x424   :  { %v1442_v45 = vpop.permute.xlu0 %1441  ;;  %1317 = vmatprep.mubr.msk.f32.mxu1 %vm549_vm5, %v643_v5 }
 0x425   :  { %v1444_v3 = vunpack.i.h.bf16 %v1442_v45  ;;  %v1443_v46 = vunpack.i.l.bf16 %v1442_v45  ;;  %v1488_v48 = vpop.eup %1487 }
 0x426   :  { %v1490_v49 = vpop.eup %1489  ;;  %v645_v51 = vmul.f32 %v1488_v48, %v1818_v14 }
 0x427   :  { %v1381_v47 = vpack.c.bf16 %v1444_v3, %v1443_v46  ;;  %v647_v55 = vmul.f32 %v1490_v49, %v1815_v9 }
 0x428   :  { %v1457_v17 = vpop.permute.xlu0 %1456 }
 0x429   :  { %1382 = vmatprep.subr.bf16.mxu1 %v1381_v47  ;;  %v1492_v52 = vpop.eup %1491  ;;  %v1459_v22 = vunpack.i.h.bf16 %v1457_v17  ;;  %v1458_v25 = vunpack.i.l.bf16 %v1457_v17 }
 0x42a   :  { %1384 = vmatpush3.bf16.msra.mxu1 %v1381_v47  ;;  %v649_v56 = vmul.f32 %v1492_v52, %v1825_v18 }
 0x42b   :  { %1386 = vmatprep.subr.bf16.mxu1 %v1385_v50  ;;  %v1393_v28 = vpack.c.bf16 %v1459_v22, %v1458_v25 }
 0x42d   :  { %1318 = vmatmul.mubr.msk.f32.vlgmr.msra.gmra.mrb[6].mxu1 %vm549_vm5, %v645_v51  ;;  %v1494_v4 = vpop.eup %1493  ;;  %1394 = vmatprep.subr.bf16.mxu0 %v1393_v28 }
 0x42e   :  { %1388 = vmatpush3.bf16.msra.mxu1 %v1385_v50  ;;  %1324 = vmatprep.mubr.msk.f32.mxu1 %vm549_vm5, %v647_v55  ;;  %v653_v11 = vmul.f32 %v1494_v4, %v1830_v23 }
 0x42f   :  { %1396 = vmatpush3.bf16.msra.mxu0 %v1393_v28 }
 0x431   :  { %1325 = vmatmul.mubr.msk.f32.vlgmr.msra.gmra.mrb[8].mxu1 %vm549_vm5, %v649_v56 }
 0x44d   :  { %v626_v58 = vpop.xlane.xlu1 %625 }
 0x44e   :  { %v636_v59 = vmax.f32 %v626_v58, 1e-30 }
 0x450   :  { %1495 = vrcp.f32 %v636_v59 }
 0x451   :  { %v1452_v60 = vpop.permute.xlu1 %1451 }
 0x452   :  { %v1454_v61 = vunpack.i.h.bf16 %v1452_v60  ;;  %v1453_v62 = vunpack.i.l.bf16 %v1452_v60 }
 0x454   :  { %v1389_v63 = vpack.c.bf16 %v1454_v61, %v1453_v62 }
 0x455   :  { %v1462_v16 = vpop.permute.xlu1 %1461 }
 0x456   :  { %1390 = vmatprep.subr.bf16.mxu1 %v1389_v63  ;;  %v1464_v18 = vunpack.i.h.bf16 %v1462_v16  ;;  %v1463_v20 = vunpack.i.l.bf16 %v1462_v16 }
 0x457   :  { %1392 = vmatpush3.bf16.msra.mxu1 %v1389_v63 }
 0x458   :  { %v1397_v27 = vpack.c.bf16 %v1464_v18, %v1463_v20 }
 0x45a   :  { %v1496_v7 = vpop.eup %1495  ;;  %1398 = vmatprep.subr.bf16.mxu0 %v1397_v27 }
 0x45b   :  { %v651_v9 = vmul.f32 %v1496_v7, %v1840_v34  ;;  %1400 = vmatpush3.bf16.msra.mxu0 %v1397_v27 }
 0x45d   :  { %1331 = vmatprep.mubr.msk.f32.mxu1 %vm549_vm5, %v651_v9 }
 0x45e   :  { %1332 = vmatmul.mubr.msk.f32.vlgmr.msra.gmra.mrb[10].mxu1 %vm549_vm5, %v653_v11 }
 0x495   :  { %v1312_v14 = vpop.f32.mrb[4].mxu1 }
 0x496   :  { %v732_v15 = vpop.f32.mrb[5].mxu1 }
 0x500   :  { %v1319_v30 = vpop.f32.mrb[6].mxu1 }
 0x501   :  { %1006 = vrot.lane.b32.xlu1 %v1319_v30, %s1598_s28  ;;  %v819_v23 = vpop.f32.mrb[7].mxu1 }
 0x502   :  { %1004 = vrot.lane.b32.xlu0 %v819_v23, %s1598_s28 }
 0x504   :  { %v1326_v31 = vpop.f32.mrb[8].mxu1 }
 0x505   :  { %1014 = vrot.lane.b32.xlu1 %v1326_v31, %s1606_s7  ;;  %v906_v32 = vpop.f32.mrb[9].mxu1 }
 0x506   :  { %1012 = vrot.lane.b32.xlu0 %v906_v32, %s1606_s7 }
 0x531   :  { %v1333_v33 = vpop.f32.mrb[10].mxu1 }
 0x532   :  { %1022 = vrot.lane.b32.xlu1 %v1333_v33, %s1607_s8  ;;  %v993_v53 = vpop.f32.mrb[11].mxu1 }
 0x533   :  { %1020 = vrot.lane.b32.xlu0 %v993_v53, %s1607_s8 }
 0x537   :  { %1050 = vrot.lane.b32.xlu0 %v1717_v13, %s1605_s6 }
 0x573   :  { %v1007_v34 = vpop.permute.xlu1 %1006 }
 0x574   :  { %v1005_v35 = vpop.permute.xlu0 %1004  ;;  %v1027_v38 = vsel %vm186_vm1, %v1312_v14, %v1007_v34 }
 0x575   :  { %v1026_v21 = vsel %vm186_vm1, %v732_v15, %v1005_v35 }
 0x577   :  { %v1015_v37 = vpop.permute.xlu1 %1014 }
 0x578   :  { %v1013_v24 = vpop.permute.xlu0 %1012  ;;  %v1029_v36 = vsel %vm549_vm5, %v1027_v38, %v1015_v37 }
 0x579   :  { %v1028_v54 = vsel %vm549_vm5, %v1026_v21, %v1013_v24 }
 0x5a4   :  { %v1023_v26 = vpop.permute.xlu1 %1022 }
 0x5a5   :  { %v1021_v19 = vpop.permute.xlu0 %1020  ;;  %v1032_v40 = vsel %vm1030_vm6, %v1029_v36, %v1023_v26 }
 0x5a6   :  { %v1031_v39 = vsel %vm1030_vm6, %v1028_v54, %v1021_v19 }
 0x5a7   :  { %1342 = vmatprep.mubr.msk.f32.mxu0 %vm72_vm0, %v1031_v39 }
 0x5a8   :  { %1343 = vmatmul.mubr.msk.f32.vlgmr.msra.gmra.mrb[6].mxu0 %vm72_vm0, %v1032_v40 }
 0x5a9   :  { %v1051_v13 = vpop.permute.xlu0 %1050 }
 0x67b   :  { %v1344_v41 = vpop.f32.mrb[6].mxu0 }
 0x67c   :  { %v1131_v42 = vadd.f32 %v1344_v41, %v1051_v13  ;;  %v1125_v29 = vpop.f32.mrb[7].mxu0 }
 0x67d   :  { %v1126_v43 = vadd.f32 %v1125_v29, %v1051_v13 }
 0x67e   :  { %v1135_v44 = vadd.f32 %v1131_v42, %v1704_v8 }
 0x67f   :  { %v1134_v2 = vadd.f32 %v1126_v43, %v1698_v6  ;;  %v1165_v6 = vsub.s32 1, %v1708_v10 }
 0x680   :  { %v1139_v5 = vsel %vm72_vm0, %v1135_v44, 0.0 }
 0x681   :  { %1140 = vadd.xlane.f32.xlu0 %v1139_v5  ;;  %v1136_v45 = vsel %vm72_vm0, %v1134_v2, 0.0  ;;  %v1166_v52 = vrot.slane %v1714_v12, %v1165_v6 }
 0x682   :  { %1137 = vadd.xlane.f32.xlu1 %v1136_v45 }
 0x70e   :  { %v1141_v0 = vpop.xlane.xlu0 %1140 }
 0x70f   :  { %v1144_v1 = vmul.f32 0.03125, %v1141_v0  ;;  %v1138_v3 = vpop.xlane.xlu1 %1137 }
 0x710   :  { %v1143_v46 = vmul.f32 0.03125, %v1138_v3 }
 0x711   :  { %v1146_v47 = vsub.f32 %v1135_v44, %v1144_v1 }
 0x712   :  { %v1145_v48 = vsub.f32 %v1134_v2, %v1143_v46 }
 0x713   :  { %v1148_v49 = vmul.f32 %v1146_v47, %v1146_v47 }
 0x714   :  { %v1147_v50 = vmul.f32 %v1145_v48, %v1145_v48 }
 0x715   :  { %v1152_v51 = vsel %vm72_vm0, %v1148_v49, 0.0 }
 0x716   :  { %1153 = vadd.xlane.f32.xlu1 %v1152_v51  ;;  %v1149_v8 = vsel %vm72_vm0, %v1147_v50, 0.0 }
 0x717   :  { %1150 = vadd.xlane.f32.xlu0 %v1149_v8 }
 0x72d   :  { %1170 = vrot.lane.b32.xlu0 %v1166_v52, %s1603_s30 }
 0x7a3   :  { %v1154_v55 = vpop.xlane.xlu1 %1153 }
 0x7a4   :  { %v1156_v56 = vmul.f32 0.03125, %v1154_v55  ;;  %v1151_v57 = vpop.xlane.xlu0 %1150 }
 0x7a5   :  { %v1155_v58 = vmul.f32 0.03125, %v1151_v57 }
 0x7a6   :  { %v1158_v59 = vadd.f32 1e-05, %v1156_v56 }
 0x7a7   :  { %v1157_v60 = vadd.f32 1e-05, %v1155_v58 }
 0x7a8   :  { %1497 = vrsqrt.f32 %v1158_v59  ;;  %v1171_v7 = vpop.permute.xlu0 %1170 }
 0x7a9   :  { %1499 = vrsqrt.f32 %v1157_v60 }
 0x7b2   :  { %v1498_v61 = vpop.eup %1497 }
 0x7b3   :  { %v1500_v62 = vpop.eup %1499  ;;  %v1162_v63 = vmul.f32 %v1498_v61, %v1146_v47 }
 0x7b4   :  { %v1161_v4 = vmul.f32 %v1500_v62, %v1145_v48 }
 0x7b5   :  { %v1168_v9 = vmul.f32 %v1166_v52, %v1162_v63 }
 0x7b6   :  { %v1167_v10 = vmul.f32 %v1166_v52, %v1161_v4 }
 0x7b7   :  { %v1174_v12 = vadd.f32 %v1171_v7, %v1168_v9 }
 0x7b8   :  { %v1173_v11 = vadd.f32 %v1171_v7, %v1167_v10 }
 0x7b9   :  { %1176 = vst.msk [vmem:[#allocation8 + $0x8] sm:$0xff] %vm72_vm0, %v1174_v12 }
 0x7ba   :  { %1175 = vst.msk [vmem:[#allocation8] sm:$0xff] %vm72_vm0, %v1173_v11 }
 0x7bb   :  { %1578 = shalt.err (!%p1575_p0)
}
 0x7bc   :  { %s1579_s13 = scalar_lea.hbm %s1908_s4, 256 }
 0x7bd   :  { %p1580_p1 = scmp.ne.s32.totalorder %s1908_s4, %s1579_s13  ;;  %p1583_p2 = scmp.lt.u32.totalorder %s1579_s13, %s1908_s4 }
 0x7bf   :  { %p1585_p3 = pnand %p1583_p2, %p1580_p1 }
 0x7c1   :  { %1588 = shalt.err (!%p1585_p3)
}
 0x7c2   :  { %1188 = dma.vmem_to_hbm [thread:$0]  %s1183_s10, 256, %s1908_s4, [#allocation4], %s1597_s27, %s1597_s27, %s1598_s28  }
 0x7c3   :  { %1593 = dma.done.wait [#allocation4], 256  }
 0x7c4   :  { %1594 = vsyncadd [#allocation4], 4294967040 }
 0x7c5   :  { %1192 = vsyncpa [#allocation3], 1 }
 0x7c6   :  { %1193 = vsyncpa [#allocation6], 1 }
 0x7c7   :  { %1194 = vsyncpa [#allocation4], 1 }

</bundles_post_ra>
